<compile_context>
chip_gen: v5e
topology: v5e:2x2
jax: 0.10.0
libtpu: 0.0.40
codegen_flags: <defaults>
</compile_context>

<pallas_src>
import jax
import jax.numpy as jnp
from jax.experimental import pallas as pl
from jax.experimental.pallas import tpu as pltpu


def dueling_q_kernel(x_ref, w1_ref, w2_ref, w4_ref, b_ref, q_ref, asum_ref):
    """Fused dueling-Q forward for one batch tile.

    x_ref : (tile_b, S)   f32
    w1_ref: (S, 2H)       bf16  [value | advantage] first layers, concat on N
    w2_ref: (2, H, H)     bf16  [w2_val, w2_adv] stacked (no zero padding)
    w4_ref: (2, H, A+1)   bf16  [value-head rows, adv-head rows]; col A = value
    b_ref : (3, 2H)       f32   row0=b1, row1=b2, row2[:A]=b4_adv, row2[A]=b4_val
    q_ref : (tile_b, A)   f32   val + adv   (global-mean correction applied outside)
    asum_ref: (1, 1, 1)   f32   this tile's sum(adv) for the global mean
    """
    A = q_ref.shape[1]
    H = w2_ref.shape[1]

    x = x_ref[...].astype(jnp.bfloat16)

    # layer 1 — both streams in one 256-wide MXU dot
    h = jnp.dot(x, w1_ref[...], preferred_element_type=jnp.float32) + b_ref[0:1, :]
    h = jnp.maximum(h, 0.0).astype(jnp.bfloat16)        # ReLU on the f32 accumulator

    # layer 2 — two native 128-wide dots; no block-diagonal zeros in HBM
    hv = jnp.dot(h[:, :H], w2_ref[0], preferred_element_type=jnp.float32) + b_ref[1:2, :H]
    ha = jnp.dot(h[:, H:], w2_ref[1], preferred_element_type=jnp.float32) + b_ref[1:2, H:]
    hv = jnp.maximum(hv, 0.0).astype(jnp.bfloat16)
    ha = jnp.maximum(ha, 0.0).astype(jnp.bfloat16)

    # heads — cols 0..A-1 = advantage, col A = value
    y = (jnp.dot(hv, w4_ref[0], preferred_element_type=jnp.float32)
         + jnp.dot(ha, w4_ref[1], preferred_element_type=jnp.float32)
         + b_ref[2:3, :A + 1])

    adv = y[:, :A]              # (tile_b, A)
    val = y[:, A:A + 1]         # (tile_b, 1)

    # torch adv.mean() (no dim) couples batch tiles, so each tile only emits
    # its partial adv sum; the scalar subtraction happens in the wrapper.
    q_ref[...] = val + adv
    asum_ref[...] = jnp.sum(adv).reshape(1, 1, 1)


def _pick_tile(batch, max_tile=512):
    """Largest sublane-aligned tile <= max_tile that divides batch."""
    if batch <= max_tile:
        return batch
    for t in range(max_tile, 7, -8):
        if batch % t == 0:
            return t
    return batch


def dueling_q_forward(x, packed_params, *, tile_b=None):
    W1, W2s, W4s, Bp = packed_params
    batch, S = x.shape
    H = W2s.shape[1]
    A = W4s.shape[2] - 1

    if tile_b is None:
        tile_b = _pick_tile(batch)
    assert batch % tile_b == 0, "tile_b must divide batch"
    assert tile_b == batch or tile_b % 8 == 0, "tile_b must be sublane-aligned"
    num_tiles = batch // tile_b

    flops = 2 * batch * (S * 2 * H + 2 * H * H + 2 * H * (A + 1))
    bytes_accessed = (
        x.size * x.dtype.itemsize
        + sum(int(a.size) * a.dtype.itemsize for a in packed_params)
        + batch * A * 4
        + num_tiles * 4
    )

    q_partial, adv_sums = pl.pallas_call(
        dueling_q_kernel,
        out_shape=(
            jax.ShapeDtypeStruct((batch, A), jnp.float32),
            jax.ShapeDtypeStruct((num_tiles, 1, 1), jnp.float32),
        ),
        grid=(num_tiles,),
        in_specs=[
            pl.BlockSpec((tile_b, S), lambda i: (i, 0)),     # x streams per tile
            pl.BlockSpec(W1.shape, lambda i: (0, 0)),        # weights: constant
            pl.BlockSpec(W2s.shape, lambda i: (0, 0, 0)),    #   index -> DMA'd once,
            pl.BlockSpec(W4s.shape, lambda i: (0, 0, 0)),    #   VMEM-resident across
            pl.BlockSpec(Bp.shape, lambda i: (0, 0)),        #   all grid steps
        ],
        out_specs=(
            pl.BlockSpec((tile_b, A), lambda i: (i, 0)),
            pl.BlockSpec((1, 1, 1), lambda i: (i, 0, 0)),
        ),
        compiler_params=pltpu.CompilerParams(
            # Each tile owns its own output blocks -> batch axis is truly
            # parallel; on v7x this shards the grid across both TensorCores.
            dimension_semantics=("parallel",)),
        cost_estimate=pl.CostEstimate(
            flops=flops, transcendentals=0, bytes_accessed=bytes_accessed),
    )(x, W1, W2s, W4s, Bp)

    # Exact module semantics: Q = val + adv - adv.mean()   (GLOBAL mean).
    # Doing the scalar correction here keeps the kernel grid batch-parallel.
    return q_partial - jnp.sum(adv_sums) / (batch * A)


def init_linear(key, fan_in, fan_out):
    """Deterministic init mimicking torch.nn.Linear (U(-1/sqrt(in), 1/sqrt(in))).

    Weight returned as (in, out) so the math is x @ W.  Bias is (1, out).
    """
    kw, kb = jax.random.split(key)
    bound = 1.0 / jnp.sqrt(jnp.float32(fan_in))
    w = jax.random.uniform(kw, (fan_in, fan_out), jnp.float32, -bound, bound)
    b = jax.random.uniform(kb, (1, fan_out), jnp.float32, -bound, bound)
    return w, b


def pack_params(raw):
    """Host-side fusion of the 12 per-layer tensors into 4 kernel operands."""
    (w1v, b1v, w2v, b2v, w4v, b4v,
     w1a, b1a, w2a, b2a, w4a, b4a) = raw
    S, H = w1v.shape
    A = w4a.shape[1]
    assert w2v.shape == (H, H) and w2a.shape == (H, H), "packing assumes hidsize1 == hidsize2"
    assert A + 1 <= 2 * H, "head biases must fit in one (1, 2H) row"

    W1 = jnp.concatenate([w1v, w1a], axis=1)               # (S, 2H)
    W2s = jnp.stack([w2v, w2a], axis=0)                    # (2, H, H) — no zero half

    w4_top = jnp.zeros((H, A + 1), jnp.float32).at[:, A].set(w4v[:, 0])   # value head
    w4_bot = jnp.zeros((H, A + 1), jnp.float32).at[:, :A].set(w4a)        # advantage head
    W4s = jnp.stack([w4_top, w4_bot], axis=0)              # (2, H, A+1)

    Bp = jnp.zeros((3, 2 * H), jnp.float32)
    Bp = Bp.at[0, :].set(jnp.concatenate([b1v, b1a], axis=1)[0])
    Bp = Bp.at[1, :].set(jnp.concatenate([b2v, b2a], axis=1)[0])
    Bp = Bp.at[2, :A].set(b4a[0])
    Bp = Bp.at[2, A].set(b4v[0, 0])

    # Weights in bf16 for the MXU (f32 accumulation in-kernel); biases stay f32.
    return (W1.astype(jnp.bfloat16), W2s.astype(jnp.bfloat16),
            W4s.astype(jnp.bfloat16), Bp)


def reference_forward(x, raw):
    """Unfused JAX reference with the SAME dtype policy as the kernel
    (bf16 matmul operands, f32 accumulation, ReLU in f32)."""
    (w1v, b1v, w2v, b2v, w4v, b4v,
     w1a, b1a, w2a, b2a, w4a, b4a) = raw

    def lin(h, w, b):
        return jnp.dot(h.astype(jnp.bfloat16), w.astype(jnp.bfloat16),
                       preferred_element_type=jnp.float32) + b

    val = jax.nn.relu(lin(x, w1v, b1v))
    val = jax.nn.relu(lin(val, w2v, b2v))
    val = lin(val, w4v, b4v)                      # (B, 1)
    adv = jax.nn.relu(lin(x, w1a, b1a))
    adv = jax.nn.relu(lin(adv, w2a, b2a))
    adv = lin(adv, w4a, b4a)                      # (B, A)
    return val + adv - jnp.mean(adv)              # GLOBAL mean, like torch .mean()


if __name__ == "__main__":
    # Small shapes consistent with the module (state-vector input); batch is
    # 256 with tile_b=128 so the batch-tiled grid actually runs 2 steps and
    # exercises resident weights + the parallel batch axis.
    batch = 256
    state_size = 32
    action_size = 8
    hidsize1 = 128
    hidsize2 = 128

    root = jax.random.PRNGKey(0)
    kx, k1v, k2v, k4v, k1a, k2a, k4a = jax.random.split(root, 7)

    x = jax.random.normal(kx, (batch, state_size), jnp.float32)

    w1v, b1v = init_linear(k1v, state_size, hidsize1)
    w2v, b2v = init_linear(k2v, hidsize1, hidsize2)
    w4v, b4v = init_linear(k4v, hidsize2, 1)
    w1a, b1a = init_linear(k1a, state_size, hidsize1)
    w2a, b2a = init_linear(k2a, hidsize1, hidsize2)
    w4a, b4a = init_linear(k4a, hidsize2, action_size)

    raw_params = (w1v, b1v, w2v, b2v, w4v, b4v,
                  w1a, b1a, w2a, b2a, w4a, b4a)
    packed = pack_params(raw_params)

    out = dueling_q_forward(x, packed, tile_b=128)
    out = jax.block_until_ready(out)

    ref = jax.block_until_ready(reference_forward(x, raw_params))
    assert out.shape == (batch, action_size)
    assert jnp.allclose(out, ref, atol=1e-3, rtol=1e-3), "mismatch vs JAX reference"

    print("KERNEL_OK")
</pallas_src>

<mosaic_0001>
module attributes {stable_mosaic.version = 11 : i64} {
  func.func @dueling_q_kernel(%arg0: i32, %arg1: memref<128x32xf32, #tpu.memory_space<vmem>>, %arg2: memref<32x256xbf16, #tpu.memory_space<vmem>>, %arg3: memref<2x128x128xbf16, #tpu.memory_space<vmem>>, %arg4: memref<2x128x9xbf16, #tpu.memory_space<vmem>>, %arg5: memref<3x256xf32, #tpu.memory_space<vmem>>, %arg6: memref<128x8xf32, #tpu.memory_space<vmem>>, %arg7: memref<1x1x1xf32, #tpu.memory_space<vmem>>) attributes {dimension_semantics = [#tpu.dimension_semantics<parallel>], iteration_bounds = array<i64: 2>, scalar_prefetch = 0 : i64, scratch_operands = 0 : i64, tpu.core_type = #tpu.core_type<tc>, window_params = [{transform_indices = @transform_0, window_bounds = array<i64: 128, 32>}, {pipeline_mode = #tpu.pipeline_mode<synchronous>, transform_indices = @transform_1, window_bounds = array<i64: 32, 256>}, {pipeline_mode = #tpu.pipeline_mode<synchronous>, transform_indices = @transform_2, window_bounds = array<i64: 2, 128, 128>}, {pipeline_mode = #tpu.pipeline_mode<synchronous>, transform_indices = @transform_3, window_bounds = array<i64: 2, 128, 9>}, {pipeline_mode = #tpu.pipeline_mode<synchronous>, transform_indices = @transform_4, window_bounds = array<i64: 3, 256>}, {transform_indices = @transform_5, window_bounds = array<i64: 128, 8>}, {transform_indices = @transform_6, window_bounds = array<i64: 1, 1, 1>}]} {
    %c0 = arith.constant 0 : index
    %c0_0 = arith.constant 0 : index
    %0 = vector.load %arg1[%c0, %c0_0] : memref<128x32xf32, #tpu.memory_space<vmem>>, vector<128x32xf32>
    %1 = arith.truncf %0 : vector<128x32xf32> to vector<128x32xbf16>
    %c0_1 = arith.constant 0 : index
    %c0_2 = arith.constant 0 : index
    %2 = vector.load %arg2[%c0_1, %c0_2] : memref<32x256xbf16, #tpu.memory_space<vmem>>, vector<32x256xbf16>
    %cst = arith.constant dense<0.000000e+00> : vector<128x256xf32>
    %3 = tpu.matmul %1, %2, %cst {dimension_numbers = #tpu.dot_dimension_numbers<[1], [0], [0], [1], [0, 0, 1, 1], [], []>} : vector<128x32xbf16>, vector<32x256xbf16>, vector<128x256xf32> -> vector<128x256xf32>
    %c0_3 = arith.constant 0 : index
    %c0_4 = arith.constant 0 : index
    %4 = vector.load %arg5[%c0_3, %c0_4] : memref<3x256xf32, #tpu.memory_space<vmem>>, vector<1x256xf32>
    %5 = vector.broadcast %4 : vector<1x256xf32> to vector<128x256xf32>
    %6 = arith.addf %3, %5 : vector<128x256xf32>
    %cst_5 = arith.constant 0.000000e+00 : f32
    %7 = vector.broadcast %cst_5 : f32 to vector<128x256xf32>
    %8 = arith.maximumf %6, %7 : vector<128x256xf32>
    %9 = arith.truncf %8 : vector<128x256xf32> to vector<128x256xbf16>
    %10 = vector.extract_strided_slice %9 {offsets = [0, 0], sizes = [128, 128], strides = [1, 1]} : vector<128x256xbf16> to vector<128x128xbf16>
    %c0_6 = arith.constant 0 : index
    %c0_7 = arith.constant 0 : index
    %c0_8 = arith.constant 0 : index
    %11 = vector.load %arg3[%c0_6, %c0_7, %c0_8] : memref<2x128x128xbf16, #tpu.memory_space<vmem>>, vector<1x128x128xbf16>
    %12 = vector.shape_cast %11 : vector<1x128x128xbf16> to vector<128x128xbf16>
    %cst_9 = arith.constant dense<0.000000e+00> : vector<128x128xf32>
    %13 = tpu.matmul %10, %12, %cst_9 {dimension_numbers = #tpu.dot_dimension_numbers<[1], [0], [0], [1], [0, 0, 1, 1], [], []>} : vector<128x128xbf16>, vector<128x128xbf16>, vector<128x128xf32> -> vector<128x128xf32>
    %c1 = arith.constant 1 : index
    %c0_10 = arith.constant 0 : index
    %14 = vector.load %arg5[%c1, %c0_10] : memref<3x256xf32, #tpu.memory_space<vmem>>, vector<1x128xf32>
    %15 = vector.broadcast %14 : vector<1x128xf32> to vector<128x128xf32>
    %16 = arith.addf %13, %15 : vector<128x128xf32>
    %17 = vector.extract_strided_slice %9 {offsets = [0, 128], sizes = [128, 128], strides = [1, 1]} : vector<128x256xbf16> to vector<128x128xbf16>
    %c1_11 = arith.constant 1 : index
    %c0_12 = arith.constant 0 : index
    %c0_13 = arith.constant 0 : index
    %18 = vector.load %arg3[%c1_11, %c0_12, %c0_13] : memref<2x128x128xbf16, #tpu.memory_space<vmem>>, vector<1x128x128xbf16>
    %19 = vector.shape_cast %18 : vector<1x128x128xbf16> to vector<128x128xbf16>
    %cst_14 = arith.constant dense<0.000000e+00> : vector<128x128xf32>
    %20 = tpu.matmul %17, %19, %cst_14 {dimension_numbers = #tpu.dot_dimension_numbers<[1], [0], [0], [1], [0, 0, 1, 1], [], []>} : vector<128x128xbf16>, vector<128x128xbf16>, vector<128x128xf32> -> vector<128x128xf32>
    %c1_15 = arith.constant 1 : index
    %c128 = arith.constant 128 : index
    %21 = vector.load %arg5[%c1_15, %c128] : memref<3x256xf32, #tpu.memory_space<vmem>>, vector<1x128xf32>
    %22 = vector.broadcast %21 : vector<1x128xf32> to vector<128x128xf32>
    %23 = arith.addf %20, %22 : vector<128x128xf32>
    %cst_16 = arith.constant 0.000000e+00 : f32
    %24 = vector.broadcast %cst_16 : f32 to vector<128x128xf32>
    %25 = arith.maximumf %16, %24 : vector<128x128xf32>
    %26 = arith.truncf %25 : vector<128x128xf32> to vector<128x128xbf16>
    %cst_17 = arith.constant 0.000000e+00 : f32
    %27 = vector.broadcast %cst_17 : f32 to vector<128x128xf32>
    %28 = arith.maximumf %23, %27 : vector<128x128xf32>
    %29 = arith.truncf %28 : vector<128x128xf32> to vector<128x128xbf16>
    %c0_18 = arith.constant 0 : index
    %c0_19 = arith.constant 0 : index
    %c0_20 = arith.constant 0 : index
    %30 = vector.load %arg4[%c0_18, %c0_19, %c0_20] : memref<2x128x9xbf16, #tpu.memory_space<vmem>>, vector<1x128x9xbf16>
    %31 = vector.shape_cast %30 : vector<1x128x9xbf16> to vector<128x9xbf16>
    %cst_21 = arith.constant dense<0.000000e+00> : vector<128x9xf32>
    %32 = tpu.matmul %26, %31, %cst_21 {dimension_numbers = #tpu.dot_dimension_numbers<[1], [0], [0], [1], [0, 0, 1, 1], [], []>} : vector<128x128xbf16>, vector<128x9xbf16>, vector<128x9xf32> -> vector<128x9xf32>
    %c1_22 = arith.constant 1 : index
    %c0_23 = arith.constant 0 : index
    %c0_24 = arith.constant 0 : index
    %33 = vector.load %arg4[%c1_22, %c0_23, %c0_24] : memref<2x128x9xbf16, #tpu.memory_space<vmem>>, vector<1x128x9xbf16>
    %34 = vector.shape_cast %33 : vector<1x128x9xbf16> to vector<128x9xbf16>
    %cst_25 = arith.constant dense<0.000000e+00> : vector<128x9xf32>
    %35 = tpu.matmul %29, %34, %cst_25 {dimension_numbers = #tpu.dot_dimension_numbers<[1], [0], [0], [1], [0, 0, 1, 1], [], []>} : vector<128x128xbf16>, vector<128x9xbf16>, vector<128x9xf32> -> vector<128x9xf32>
    %36 = arith.addf %32, %35 : vector<128x9xf32>
    %c2 = arith.constant 2 : index
    %c0_26 = arith.constant 0 : index
    %37 = vector.load %arg5[%c2, %c0_26] : memref<3x256xf32, #tpu.memory_space<vmem>>, vector<1x9xf32>
    %38 = vector.broadcast %37 : vector<1x9xf32> to vector<128x9xf32>
    %39 = arith.addf %36, %38 : vector<128x9xf32>
    %40 = vector.extract_strided_slice %39 {offsets = [0, 0], sizes = [128, 8], strides = [1, 1]} : vector<128x9xf32> to vector<128x8xf32>
    %41 = vector.extract_strided_slice %39 {offsets = [0, 8], sizes = [128, 1], strides = [1, 1]} : vector<128x9xf32> to vector<128x1xf32>
    %42 = vector.broadcast %41 : vector<128x1xf32> to vector<128x8xf32>
    %43 = arith.addf %42, %40 : vector<128x8xf32>
    %c0_27 = arith.constant 0 : index
    %c0_28 = arith.constant 0 : index
    %44 = vector.load %arg6[%c0_27, %c0_28] : memref<128x8xf32, #tpu.memory_space<vmem>>, vector<128x8xf32>
    tpu.vector_store %arg6[%c0_27, %c0_28], %43 {strides = array<i32>} : memref<128x8xf32, #tpu.memory_space<vmem>>, vector<128x8xf32>,
    %45 = vector.shape_cast %40 : vector<128x8xf32> to vector<1x128x8xf32>
    %cst_29 = arith.constant dense<0.000000e+00> : vector<1xf32>
    %46 = vector.multi_reduction <add>, %45, %cst_29 [1, 2] : vector<1x128x8xf32> to vector<1xf32>
    %47 = vector.shape_cast %46 : vector<1xf32> to vector<1x1x1xf32>
    %48 = vector.extract %47[0, 0, 0] : f32 from vector<1x1x1xf32>
    %49 = vector.broadcast %48 : f32 to vector<1x1x1xf32>
    %c0_30 = arith.constant 0 : index
    %c0_31 = arith.constant 0 : index
    %c0_32 = arith.constant 0 : index
    %50 = vector.load %arg7[%c0_30, %c0_31, %c0_32] : memref<1x1x1xf32, #tpu.memory_space<vmem>>, vector<1x1x1xf32>
    tpu.vector_store %arg7[%c0_30, %c0_31, %c0_32], %49 {strides = array<i32>} : memref<1x1x1xf32, #tpu.memory_space<vmem>>, vector<1x1x1xf32>,
    return
  }
  func.func @transform_0(%arg0: i32) -> (i32, i32) {
    %c0_i32 = arith.constant 0 : i32
    %c0_i32_0 = arith.constant 0 : i32
    return %arg0, %c0_i32 : i32, i32
  }
  func.func @transform_1(%arg0: i32) -> (i32, i32) {
    %c0_i32 = arith.constant 0 : i32
    %c0_i32_0 = arith.constant 0 : i32
    %c0_i32_1 = arith.constant 0 : i32
    return %c0_i32, %c0_i32_0 : i32, i32
  }
  func.func @transform_2(%arg0: i32) -> (i32, i32, i32) {
    %c0_i32 = arith.constant 0 : i32
    %c0_i32_0 = arith.constant 0 : i32
    %c0_i32_1 = arith.constant 0 : i32
    %c0_i32_2 = arith.constant 0 : i32
    return %c0_i32, %c0_i32_0, %c0_i32_1 : i32, i32, i32
  }
  func.func @transform_3(%arg0: i32) -> (i32, i32, i32) {
    %c0_i32 = arith.constant 0 : i32
    %c0_i32_0 = arith.constant 0 : i32
    %c0_i32_1 = arith.constant 0 : i32
    %c0_i32_2 = arith.constant 0 : i32
    return %c0_i32, %c0_i32_0, %c0_i32_1 : i32, i32, i32
  }
  func.func @transform_4(%arg0: i32) -> (i32, i32) {
    %c0_i32 = arith.constant 0 : i32
    %c0_i32_0 = arith.constant 0 : i32
    %c0_i32_1 = arith.constant 0 : i32
    return %c0_i32, %c0_i32_0 : i32, i32
  }
  func.func @transform_5(%arg0: i32) -> (i32, i32) {
    %c0_i32 = arith.constant 0 : i32
    %c0_i32_0 = arith.constant 0 : i32
    return %arg0, %c0_i32 : i32, i32
  }
  func.func @transform_6(%arg0: i32) -> (i32, i32, i32) {
    %c0_i32 = arith.constant 0 : i32
    %c0_i32_0 = arith.constant 0 : i32
    %c0_i32_1 = arith.constant 0 : i32
    return %arg0, %c0_i32, %c0_i32_0 : i32, i32, i32
  }
}

</mosaic_0001>

<bundles_post_ra>
// kernel: tpu_custom_call.1
= control target key start
LH: loop header
LB: loop body
LE: loop exit
PB: predicated region body
PF: predicated region fallthrough
CT: control target
= control target key end

     0   :  { %s1643_s21 = smov 0   ;;  %s2056_s0 = inlined_call_operand.vmem [shape: f32[256,32], index: 0, kind: input, shape index: {}]   ;;  %s2057_s1 = inlined_call_operand.vmem [shape: bf16[32,256], index: 1, kind: input, shape index: {}]   ;;  %s2058_s2 = inlined_call_operand.vmem [shape: bf16[2,128,128], index: 2, kind: input, shape index: {}]   ;;  %s2059_s3 = inlined_call_operand.vmem [shape: bf16[2,128,9], index: 3, kind: input, shape index: {}]   ;;  %s2060_s4 = inlined_call_operand.vmem [shape: f32[3,256], index: 4, kind: input, shape index: {}]   ;;  %s2061_s5 = inlined_call_operand.vmem [shape: f32[256,8], index: 5, kind: output, shape index: {0}]   ;;  %s2062_s6 = inlined_call_operand.vmem [shape: f32[2,1,1], index: 6, kind: output, shape index: {1}]  }
   0x1 LB: > { %s1649_s22 = sadd.s32 4294967295, %s1605_s21   ;;  %p1335_p0 = scmp.ge.s32.totalorder %s1605_s21, 1  ;;  %s1605_s21 = sphi %s1643_s21, %s17_s21  }
   0x2   : > { %p216_p1 = scmp.lt.s32.totalorder %s1605_s21, 3 }
   0x4   : > { %p217_p2 = pnand %p1335_p0, %p216_p1 }
   0x5   : > { %s1336_s15 = sshll.u32 (!%p217_p2), %s1649_s22, 4  ;;  %p261_p4 = scmp.lt.s32.totalorder (!%p217_p2), %s1649_s22, 1 }
   0x6   : > { %220 = sbr.rel (%p217_p2) target bundleno = 751 (0x2ef), region = 40  ;;  %p250_p3 = scmp.lt.s32.totalorder (!%p217_p2), %s1336_s15, 31 }
   0xb   : > { %v1350_v0 = vld [vmem:[%s2057_s1 + $0x10] sm:$0xf]  ;;  %v1537_v1 = vld [vmem:[%s2057_s1 + $0x14] sm:$0xf0]  ;;  %v1536_v2 = vld [vmem:[%s2057_s1 + $0x14] sm:$0xf] }
   0xc   : > { %v1351_v3 = vor.u32 %v1537_v1, %v1350_v0  ;;  %v1352_v4 = vld [vmem:[%s2057_s1 + $0x18] sm:$0xf0]  ;;  %v1342_v5 = vld [vmem:[%s2057_s1] sm:$0xf]  ;;  %v1535_v6 = vld [vmem:[%s2057_s1 + $0x4] sm:$0xf0] }
   0xd   : > { %v1355_v7 = vor.u32 %v1536_v2, %v1352_v4  ;;  %v1534_v8 = vld [vmem:[%s2057_s1 + $0x4] sm:$0xf]  ;;  %v1344_v9 = vld [vmem:[%s2057_s1 + $0x8] sm:$0xf0]  ;;  %v1343_v10 = vor.u32 %v1535_v6, %v1342_v5  ;;  %s2064_s15 = smov (!%p250_p3, %s1336_s15), 31  ;;  %vm319_vm0 = vcmask 261120  }
   0xe   : > { %350 = vmatpush.bf16.msra.mxu0 %v1351_v3  ;;  %1570 = vmatpush.bf16.msra.mxu2 %v1351_v3  ;;  %v1347_v11 = vor.u32 %v1534_v8, %v1344_v9  ;;  %s1337_s16 = sshll.u32 %s2064_s15, 3  ;;  %v1553_v27 = vld [vmem:[%s2058_s2 + $0x78] sm:$0xff]  ;;  %v1552_v29 = vld [vmem:[%s2058_s2 + $0x70] sm:$0xff]  ;;  %v1551_v31 = vld [vmem:[%s2058_s2 + $0x68] sm:$0xff]  ;;  %vm1190_vm1 = vcmask 64512   ;;  %s2066_s22 = smov (!%p261_p4, %s1649_s22), 1 }
   0xf   : > { %399 = vmatpush.bf16.msra.mxu1 %v1355_v7  ;;  %1572 = vmatpush.bf16.msra.mxu3 %v1355_v7  ;;  %s1686_s19 = scalar_lea.vmem %s2056_s0, %s1337_s16  ;;  %v1545_v28 = vld [vmem:[%s2058_s2 + $0x38] sm:$0xff]  ;;  %v1544_v30 = vld [vmem:[%s2058_s2 + $0x30] sm:$0xff]  ;;  %v1543_v32 = vld [vmem:[%s2058_s2 + $0x28] sm:$0xff]  ;;  %s1983_s12 = scalar_lea.vmem %s2061_s5, %s1337_s16  ;;  %vm1248_vm2 = vcmask 0  }
  0x10   : > { %v265_v12 = vld [vmem:[%s1686_s19] sm:$0xff]  ;;  %v266_v13 = vld [vmem:[%s1686_s19 + $0x8] sm:$0xff]  ;;  %v267_v15 = vld [vmem:[%s1686_s19 + $0x10] sm:$0xff]  ;;  %s263_s13 = scalar_lea.vmem %s2062_s6, %s2066_s22 }
  0x11   : > { %v281_v14 = vpack.c.bf16 %v266_v13, %v265_v12  ;;  %v268_v16 = vld [vmem:[%s1686_s19 + $0x18] sm:$0xff]  ;;  %v273_v18 = vld [vmem:[%s1686_s19 + $0x40] sm:$0xff]  ;;  %v274_v19 = vld [vmem:[%s1686_s19 + $0x48] sm:$0xff] }
  0x12   : > { %351 = vmatpush.bf16.msra.mxu0 %v1343_v10  ;;  %1571 = vmatpush.bf16.msra.mxu2 %v1343_v10  ;;  %v282_v17 = vpack.c.bf16 %v268_v16, %v267_v15  ;;  %v285_v20 = vpack.c.bf16 %v274_v19, %v273_v18  ;;  %v269_v21 = vld [vmem:[%s1686_s19 + $0x20] sm:$0xff]  ;;  %v270_v22 = vld [vmem:[%s1686_s19 + $0x28] sm:$0xff]  ;;  %v275_v24 = vld [vmem:[%s1686_s19 + $0x50] sm:$0xff] }
  0x13   : > { %400 = vmatpush.bf16.msra.mxu1 %v1347_v11  ;;  %1573 = vmatpush.bf16.msra.mxu3 %v1347_v11  ;;  %v283_v23 = vpack.c.bf16 %v270_v22, %v269_v21  ;;  %v276_v25 = vld [vmem:[%s1686_s19 + $0x58] sm:$0xff]  ;;  %v271_v33 = vld [vmem:[%s1686_s19 + $0x30] sm:$0xff]  ;;  %v277_v35 = vld [vmem:[%s1686_s19 + $0x60] sm:$0xff] }
  0x14   : > { %v286_v26 = vpack.c.bf16 %v276_v25, %v275_v24  ;;  %v272_v34 = vld [vmem:[%s1686_s19 + $0x38] sm:$0xff]  ;;  %v278_v36 = vld [vmem:[%s1686_s19 + $0x68] sm:$0xff]  ;;  %v1550_v37 = vld [vmem:[%s2058_s2 + $0x60] sm:$0xff] }
  0x15   : > { %1356 = vmatmul.msk.bf16.vlgmr.msra.gmra.mxu0 %vm319_vm0, %v281_v14  ;;  %v284_v38 = vpack.c.bf16 %v272_v34, %v271_v33  ;;  %v1542_v39 = vld [vmem:[%s2058_s2 + $0x20] sm:$0xff]  ;;  %v287_v40 = vpack.c.bf16 %v278_v36, %v277_v35  ;;  %v1549_v41 = vld [vmem:[%s2058_s2 + $0x58] sm:$0xff]  ;;  %v1548_v42 = vld [vmem:[%s2058_s2 + $0x50] sm:$0xff] }
  0x16   : > { %1364 = vmatmul.msk.bf16.vlgmr.msra.gmra.mxu1 %vm319_vm0, %v281_v14  ;;  %1368 = vmatmul.msk.bf16.vlgmr.msra.gmra.mxu3 %vm319_vm0, %v285_v20  ;;  %v279_v43 = vld [vmem:[%s1686_s19 + $0x70] sm:$0xff]  ;;  %v280_v44 = vld [vmem:[%s1686_s19 + $0x78] sm:$0xff]  ;;  %v1547_v48 = vld [vmem:[%s2058_s2 + $0x48] sm:$0xff] }
  0x17   : > { %1361 = vmatmul.msk.bf16.vlgmr.msra.gmra.mxu2 %vm319_vm0, %v286_v26  ;;  %752 = vmatpush.bf16.msrb.mxu3 %v1553_v27  ;;  %v288_v45 = vpack.c.bf16 %v280_v44, %v279_v43  ;;  %v1541_v46 = vld [vmem:[%s2058_s2 + $0x18] sm:$0xff]  ;;  %v1540_v47 = vld [vmem:[%s2058_s2 + $0x10] sm:$0xff]  ;;  %v1539_v49 = vld [vmem:[%s2058_s2 + $0x8] sm:$0xff] }
  0x18   : > { %604 = vmatpush.bf16.msrb.mxu2 %v1545_v28  ;;  %v1546_v50 = vld [vmem:[%s2058_s2 + $0x40] sm:$0xff] }
  0x19   : > { %v1538_v51 = vld [vmem:[%s2058_s2] sm:$0xff] }
  0x1a   : > { %v293_v52 = vld [vmem:[%s2060_s4] ss:$4 sm:$0x3] }
  0x1b   : > { %753 = vmatpush.bf16.msrb.mxu3 %v1552_v29  ;;  %v1771_v53 = vperm.slane %v293_v52, 0  ;;  %v1773_v54 = vperm.slane %v293_v52, 1 }
  0x1c   : > { %605 = vmatpush.bf16.msrb.mxu2 %v1544_v30 }
  0x1f   : > { %754 = vmatpush.bf16.msrb.mxu3 %v1551_v31 }
  0x20   : > { %606 = vmatpush.bf16.msrb.mxu2 %v1543_v32 }
  0x23   : > { %755 = vmatpush.bf16.msrb.mxu3 %v1550_v37 }
  0x24   : > { %607 = vmatpush.bf16.msrb.mxu2 %v1542_v39 }
  0x25   : > { %1357 = vmatmul.msk.bf16.gmra.mxu0 %vm319_vm0, %v282_v17 }
  0x26   : > { %1365 = vmatmul.msk.bf16.gmra.mxu1 %vm319_vm0, %v282_v17  ;;  %1369 = vmatmul.msk.bf16.gmra.mxu3 %vm319_vm0, %v286_v26 }
  0x27   : > { %1362 = vmatmul.msk.bf16.gmra.mxu2 %vm319_vm0, %v287_v40  ;;  %756 = vmatpush.bf16.msrb.mxu3 %v1549_v41 }
  0x28   : > { %608 = vmatpush.bf16.msrb.mxu2 %v1541_v46 }
  0x2b   : > { %757 = vmatpush.bf16.msrb.mxu3 %v1548_v42 }
  0x2c   : > { %609 = vmatpush.bf16.msrb.mxu2 %v1540_v47 }
  0x2f   : > { %758 = vmatpush.bf16.msrb.mxu3 %v1547_v48 }
  0x30   : > { %610 = vmatpush.bf16.msrb.mxu2 %v1539_v49 }
  0x33   : > { %759 = vmatpush.bf16.msrb.mxu3 %v1546_v50 }
  0x34   : > { %611 = vmatpush.bf16.msrb.mxu2 %v1538_v51 }
  0x35   : > { %1358 = vmatmul.msk.bf16.gmra.mxu0 %vm319_vm0, %v283_v23 }
  0x36   : > { %1366 = vmatmul.msk.bf16.gmra.mxu1 %vm319_vm0, %v283_v23  ;;  %1370 = vmatmul.msk.bf16.gmra.mxu3 %vm319_vm0, %v287_v40 }
  0x37   : > { %1363 = vmatmul.msk.bf16.gmra.mxu2 %vm319_vm0, %v288_v45 }
  0x45   : > { %1359 = vmatmul.msk.bf16.gmra.mxu0 %vm319_vm0, %v284_v38 }
  0x46   : > { %1367 = vmatmul.msk.bf16.gmra.mxu1 %vm319_vm0, %v284_v38  ;;  %1371 = vmatmul.msk.bf16.gmra.mxu3 %vm319_vm0, %v288_v45 }
  0x55   : > { %1360 = vmatmul.msk.bf16.gmra.mxu0 %vm319_vm0, %v285_v20 }
  0x92   : > { %v353_v55 = vpop.f32.mrf.mxu0 }
  0x93   : > { %v402_v56 = vpop.f32.mrf.mxu1  ;;  %v354_v57 = vadd.f32 %v353_v55, %v1771_v53 }
  0x94   : > { %v403_v58 = vadd.f32 %v402_v56, %v1773_v54 }
  0x95   : > { %v442_v59 = vmax.f32 %v354_v57, 0.0 }
  0x96   : > { %v443_v60 = vmax.f32 %v403_v58, 0.0 }
  0x98   : > { %v474_v1 = vpack.c.bf16 %v443_v60, %v442_v59 }
  0x99   : > { %v422_v37 = vpop.f32.mrf.mxu3 }
  0x9a   : > { %v355_v61 = vpop.f32.mrf.mxu0  ;;  %v524_v5 = vunpack.c.l.b16 %v474_v1  ;;  %v672_v6 = vunpack.c.h.b16 %v474_v1 }
  0x9b   : > { %v404_v62 = vpop.f32.mrf.mxu1  ;;  %v356_v63 = vadd.f32 %v355_v61, %v1771_v53 }
  0x9c   : > { %v405_v0 = vadd.f32 %v404_v62, %v1773_v54 }
  0x9d   : > { %v444_v2 = vmax.f32 %v356_v63, 0.0 }
  0x9e   : > { %v445_v3 = vmax.f32 %v405_v0, 0.0 }
  0xa0   : > { %v475_v4 = vpack.c.bf16 %v445_v3, %v444_v2 }
  0xa1   : > { %v424_v56 = vpop.f32.mrf.mxu3 }
  0xa2   : > { %v525_v7 = vunpack.c.l.b16 %v475_v4  ;;  %v673_v8 = vunpack.c.h.b16 %v475_v4  ;;  %v358_v9 = vpop.f32.mrf.mxu0  ;;  %v378_v4 = vpop.f32.mrf.mxu2 }
  0xa3   : > { %v407_v10 = vpop.f32.mrf.mxu1  ;;  %v359_v13 = vadd.f32 %v358_v9, %v1771_v53 }
  0xa4   : > { %v540_v11 = vpack.c.b16 %v525_v7, %v524_v5  ;;  %v688_v12 = vpack.c.b16 %v673_v8, %v672_v6  ;;  %v408_v14 = vadd.f32 %v407_v10, %v1773_v54 }
  0xa5   : > { %v446_v15 = vmax.f32 %v359_v13, 0.0 }
  0xa6   : > { %612 = vmatmul.bf16.vlgmr.msrb.gmra.mxu2 %v540_v11  ;;  %760 = vmatmul.bf16.vlgmr.msrb.gmra.mxu3 %v688_v12  ;;  %v447_v16 = vmax.f32 %v408_v14, 0.0  ;;  %v423_v14 = vadd.f32 %v422_v37, %v1773_v54 }
  0xa8   : > { %v476_v21 = vpack.c.bf16 %v447_v16, %v446_v15  ;;  %v1569_v16 = vld [vmem:[%s2059_s3 + $0x78] sm:$0xff] }
  0xa9   : > { %v427_v5 = vpop.f32.mrf.mxu3  ;;  %930 = vmatpush.bf16.msrb.mxu0 %v1569_v16  ;;  %1574 = vmatpush.bf16.msra.mxu2 %v1569_v16 }
  0xaa   : > { %v360_v17 = vpop.f32.mrf.mxu0  ;;  %v526_v25 = vunpack.c.l.b16 %v476_v21  ;;  %v674_v27 = vunpack.c.h.b16 %v476_v21  ;;  %v459_v21 = vmax.f32 %v423_v14, 0.0 }
  0xab   : > { %v409_v18 = vpop.f32.mrf.mxu1  ;;  %v361_v19 = vadd.f32 %v360_v17, %v1771_v53  ;;  %v1561_v17 = vld [vmem:[%s2059_s3 + $0x38] sm:$0xff] }
  0xac   : > { %v410_v20 = vadd.f32 %v409_v18, %v1773_v54  ;;  %1027 = vmatpush.bf16.msrb.mxu1 %v1561_v17  ;;  %v1568_v18 = vld [vmem:[%s2059_s3 + $0x70] sm:$0xff] }
  0xad   : > { %v448_v22 = vmax.f32 %v361_v19, 0.0  ;;  %v380_v19 = vpop.f32.mrf.mxu2  ;;  %931 = vmatpush.bf16.msrb.mxu0 %v1568_v18  ;;  %1575 = vmatpush.bf16.msra.mxu2 %v1568_v18 }
  0xae   : > { %v449_v23 = vmax.f32 %v410_v20, 0.0 }
  0xb0   : > { %v477_v24 = vpack.c.bf16 %v449_v23, %v448_v22  ;;  %v425_v23 = vadd.f32 %v424_v56, %v1773_v54 }
  0xb1   : > { %v429_v20 = vpop.f32.mrf.mxu3 }
  0xb2   : > { %v527_v26 = vunpack.c.l.b16 %v477_v24  ;;  %v675_v28 = vunpack.c.h.b16 %v477_v24  ;;  %v363_v29 = vpop.f32.mrf.mxu0 }
  0xb3   : > { %v412_v30 = vpop.f32.mrf.mxu1  ;;  %v364_v33 = vadd.f32 %v363_v29, %v1771_v53 }
  0xb4   : > { %v541_v31 = vpack.c.b16 %v527_v26, %v526_v25  ;;  %v689_v32 = vpack.c.b16 %v675_v28, %v674_v27  ;;  %v413_v34 = vadd.f32 %v412_v30, %v1773_v54  ;;  %v461_v27 = vmax.f32 %v425_v23, 0.0 }
  0xb5   : > { %v450_v35 = vmax.f32 %v364_v33, 0.0 }
  0xb6   : > { %617 = vmatmul.bf16.gmra.mxu2 %v541_v31  ;;  %765 = vmatmul.bf16.gmra.mxu3 %v689_v32  ;;  %v451_v36 = vmax.f32 %v413_v34, 0.0  ;;  %v379_v34 = vadd.f32 %v378_v4, %v1771_v53 }
  0xb8   : > { %v478_v42 = vpack.c.bf16 %v451_v36, %v450_v35  ;;  %v428_v35 = vadd.f32 %v427_v5, %v1773_v54  ;;  %v383_v36 = vpop.f32.mrf.mxu2 }
  0xb9   : > { %v432_v37 = vpop.f32.mrf.mxu3 }
  0xba   : > { %v365_v38 = vpop.f32.mrf.mxu0  ;;  %v528_v46 = vunpack.c.l.b16 %v478_v42  ;;  %v676_v48 = vunpack.c.h.b16 %v478_v42  ;;  %v1560_v42 = vld [vmem:[%s2059_s3 + $0x30] sm:$0xff] }
  0xbb   : > { %v414_v39 = vpop.f32.mrf.mxu1  ;;  %v366_v40 = vadd.f32 %v365_v38, %v1771_v53  ;;  %v381_v38 = vadd.f32 %v380_v19, %v1771_v53  ;;  %1028 = vmatpush.bf16.msrb.mxu1 %v1560_v42 }
  0xbc   : > { %v415_v41 = vadd.f32 %v414_v39, %v1773_v54  ;;  %v430_v39 = vadd.f32 %v429_v20, %v1773_v54 }
  0xbd   : > { %v452_v43 = vmax.f32 %v366_v40, 0.0 }
  0xbe   : > { %v453_v44 = vmax.f32 %v415_v41, 0.0 }
  0xc0   : > { %v479_v45 = vpack.c.bf16 %v453_v44, %v452_v43  ;;  %v1567_v43 = vld [vmem:[%s2059_s3 + $0x68] sm:$0xff]  ;;  %v462_v44 = vmax.f32 %v379_v34, 0.0 }
  0xc1   : > { %932 = vmatpush.bf16.msrb.mxu0 %v1567_v43  ;;  %1576 = vmatpush.bf16.msra.mxu2 %v1567_v43  ;;  %v1858_v43 = vld [vmem:[%s2060_s4 + $0x1] ss:$0 sm:$0xff] }
  0xc2   : > { %v529_v47 = vunpack.c.l.b16 %v479_v45  ;;  %v677_v49 = vunpack.c.h.b16 %v479_v45  ;;  %v368_v50 = vpop.f32.mrf.mxu0  ;;  %v463_v45 = vmax.f32 %v428_v35, 0.0 }
  0xc3   : > { %v417_v51 = vpop.f32.mrf.mxu1  ;;  %v369_v57 = vadd.f32 %v368_v50, %v1771_v53 }
  0xc4   : > { %v542_v52 = vpack.c.b16 %v529_v47, %v528_v46  ;;  %v690_v55 = vpack.c.b16 %v677_v49, %v676_v48  ;;  %v418_v58 = vadd.f32 %v417_v51, %v1773_v54  ;;  %v464_v46 = vmax.f32 %v381_v38, 0.0  ;;  %v1559_v48 = vld [vmem:[%s2059_s3 + $0x28] sm:$0xff]  ;;  %v385_v51 = vpop.f32.mrf.mxu2  ;;  %v1554_v38 = vld [vmem:[%s2059_s3] sm:$0xff] }
  0xc5   : > { %v454_v59 = vmax.f32 %v369_v57, 0.0  ;;  %v465_v47 = vmax.f32 %v430_v39, 0.0  ;;  %v484_v49 = vpack.c.bf16 %v463_v45, %v462_v44  ;;  %1029 = vmatpush.bf16.msrb.mxu1 %v1559_v48  ;;  %v1863_v44 = vld [vmem:[%s2060_s4 + $0x5] ss:$0 sm:$0xff] }
  0xc6   : > { %622 = vmatmul.bf16.gmra.mxu2 %v542_v52  ;;  %770 = vmatmul.bf16.gmra.mxu3 %v690_v55  ;;  %v455_v60 = vmax.f32 %v418_v58, 0.0  ;;  %v434_v52 = vpop.f32.mrf.mxu3 }
  0xc7   : > { %v485_v50 = vpack.c.bf16 %v465_v47, %v464_v46  ;;  %v534_v55 = vunpack.c.l.b16 %v484_v49  ;;  %v682_v57 = vunpack.c.h.b16 %v484_v49 }
  0xc8   : > { %v480_v1 = vpack.c.bf16 %v455_v60, %v454_v59  ;;  %v384_v59 = vadd.f32 %v383_v36, %v1771_v53  ;;  %v433_v60 = vadd.f32 %v432_v37, %v1773_v54  ;;  %v1562_v37 = vld [vmem:[%s2059_s3 + $0x40] sm:$0xff] }
  0xc9   : > { %v535_v56 = vunpack.c.l.b16 %v485_v50  ;;  %v683_v58 = vunpack.c.h.b16 %v485_v50 }
  0xca   : > { %v370_v61 = vpop.f32.mrf.mxu0  ;;  %v530_v7 = vunpack.c.l.b16 %v480_v1  ;;  %v678_v9 = vunpack.c.h.b16 %v480_v1  ;;  %v1558_v1 = vld [vmem:[%s2059_s3 + $0x20] sm:$0xff]  ;;  %v466_v5 = vmax.f32 %v384_v59, 0.0 }
  0xcb   : > { %v419_v62 = vpop.f32.mrf.mxu1  ;;  %v371_v63 = vadd.f32 %v370_v61, %v1771_v53  ;;  %v386_v61 = vadd.f32 %v385_v51, %v1771_v53  ;;  %1030 = vmatpush.bf16.msrb.mxu1 %v1558_v1 }
  0xcc   : > { %v420_v0 = vadd.f32 %v419_v62, %v1773_v54  ;;  %v435_v62 = vadd.f32 %v434_v52, %v1773_v54 }
  0xcd   : > { %v456_v2 = vmax.f32 %v371_v63, 0.0  ;;  %v545_v63 = vpack.c.b16 %v535_v56, %v534_v55 }
  0xce   : > { %v457_v3 = vmax.f32 %v420_v0, 0.0  ;;  %v693_v0 = vpack.c.b16 %v683_v58, %v682_v57  ;;  %v437_v4 = vpop.f32.mrf.mxu3 }
  0xd0   : > { %v481_v6 = vpack.c.bf16 %v457_v3, %v456_v2  ;;  %v1566_v2 = vld [vmem:[%s2059_s3 + $0x60] sm:$0xff]  ;;  %v388_v3 = vpop.f32.mrf.mxu2 }
  0xd1   : > { %933 = vmatpush.bf16.msrb.mxu0 %v1566_v2  ;;  %1577 = vmatpush.bf16.msra.mxu2 %v1566_v2  ;;  %v389_v20 = vadd.f32 %v388_v3, %v1771_v53 }
  0xd2   : > { %v531_v8 = vunpack.c.l.b16 %v481_v6  ;;  %v679_v10 = vunpack.c.h.b16 %v481_v6  ;;  %v373_v11 = vpop.f32.mrf.mxu0  ;;  %v467_v6 = vmax.f32 %v433_v60, 0.0 }
  0xd3   : > { %v374_v15 = vadd.f32 %v373_v11, %v1771_v53 }
  0xd4   : > { %v543_v12 = vpack.c.b16 %v531_v8, %v530_v7  ;;  %v691_v13 = vpack.c.b16 %v679_v10, %v678_v9  ;;  %v468_v7 = vmax.f32 %v386_v61, 0.0  ;;  %v469_v8 = vmax.f32 %v435_v62, 0.0  ;;  %v1557_v9 = vld [vmem:[%s2059_s3 + $0x18] sm:$0xff] }
  0xd5   : > { %v458_v22 = vmax.f32 %v374_v15, 0.0  ;;  %v1565_v10 = vld [vmem:[%s2059_s3 + $0x58] sm:$0xff]  ;;  %v486_v11 = vpack.c.bf16 %v467_v6, %v466_v5  ;;  %1031 = vmatpush.bf16.msrb.mxu1 %v1557_v9 }
  0xd6   : > { %627 = vmatmul.bf16.gmra.mxu2 %v543_v12  ;;  %775 = vmatmul.bf16.gmra.mxu3 %v691_v13  ;;  %v487_v12 = vpack.c.bf16 %v469_v8, %v468_v7  ;;  %v1556_v13 = vld [vmem:[%s2059_s3 + $0x10] sm:$0xff]  ;;  %v439_v19 = vpop.f32.mrf.mxu3 }
  0xd7   : > { %v482_v26 = vpack.c.bf16 %v459_v21, %v458_v22  ;;  %934 = vmatpush.bf16.msrb.mxu0 %v1565_v10  ;;  %1578 = vmatpush.bf16.msra.mxu2 %v1565_v10  ;;  %v536_v14 = vunpack.c.l.b16 %v486_v11  ;;  %v684_v16 = vunpack.c.h.b16 %v486_v11  ;;  %v438_v21 = vadd.f32 %v437_v4, %v1773_v54 }
  0xd8   : > { %v537_v15 = vunpack.c.l.b16 %v487_v12  ;;  %v685_v17 = vunpack.c.h.b16 %v487_v12  ;;  %v390_v18 = vpop.f32.mrf.mxu2  ;;  %v440_v23 = vadd.f32 %v439_v19, %v1773_v54  ;;  %v1563_v54 = vld [vmem:[%s2059_s3 + $0x48] sm:$0xff] }
  0xd9   : > { %v532_v30 = vunpack.c.l.b16 %v482_v26  ;;  %v680_v32 = vunpack.c.h.b16 %v482_v26  ;;  %1032 = vmatpush.bf16.msrb.mxu1 %v1556_v13  ;;  %v391_v22 = vadd.f32 %v390_v18, %v1771_v53  ;;  %v470_v26 = vmax.f32 %v389_v20, 0.0 }
  0xda   : > { %v375_v24 = vpop.f32.mrf.mxu0 }
  0xdb   : > { %v376_v25 = vadd.f32 %v375_v24, %v1771_v53  ;;  %v546_v24 = vpack.c.b16 %v537_v15, %v536_v14  ;;  %v1555_v53 = vld [vmem:[%s2059_s3 + $0x8] sm:$0xff] }
  0xdd   : > { %v460_v28 = vmax.f32 %v376_v25, 0.0  ;;  %v694_v25 = vpack.c.b16 %v685_v17, %v684_v16  ;;  %1033 = vmatpush.bf16.msrb.mxu1 %v1555_v53 }
  0xdf   : > { %v483_v29 = vpack.c.bf16 %v461_v27, %v460_v28  ;;  %v471_v27 = vmax.f32 %v438_v21, 0.0  ;;  %v472_v28 = vmax.f32 %v391_v22, 0.0 }
  0xe1   : > { %v533_v31 = vunpack.c.l.b16 %v483_v29  ;;  %v681_v33 = vunpack.c.h.b16 %v483_v29  ;;  %v473_v29 = vmax.f32 %v440_v23, 0.0  ;;  %1034 = vmatpush.bf16.msrb.mxu1 %v1554_v38 }
  0xe3   : > { %v544_v40 = vpack.c.b16 %v533_v31, %v532_v30  ;;  %v692_v41 = vpack.c.b16 %v681_v33, %v680_v32  ;;  %v1564_v30 = vld [vmem:[%s2059_s3 + $0x50] sm:$0xff]  ;;  %v488_v31 = vpack.c.bf16 %v471_v27, %v470_v26  ;;  %v489_v32 = vpack.c.bf16 %v473_v29, %v472_v28 }
  0xe4   : > { %935 = vmatpush.bf16.msrb.mxu0 %v1564_v30  ;;  %1579 = vmatpush.bf16.msra.mxu2 %v1564_v30 }
  0xe5   : > { %v538_v33 = vunpack.c.l.b16 %v488_v31  ;;  %v539_v34 = vunpack.c.l.b16 %v489_v32  ;;  %v686_v35 = vunpack.c.h.b16 %v488_v31  ;;  %v687_v36 = vunpack.c.h.b16 %v489_v32 }
  0xe6   : > { %632 = vmatmul.bf16.gmra.mxu2 %v544_v40  ;;  %780 = vmatmul.bf16.gmra.mxu3 %v692_v41 }
  0xe7   : > { %v547_v39 = vpack.c.b16 %v539_v34, %v538_v33  ;;  %v695_v40 = vpack.c.b16 %v687_v36, %v686_v35 }
  0xe8   : > { %936 = vmatpush.bf16.msrb.mxu0 %v1563_v54  ;;  %1580 = vmatpush.bf16.msra.mxu2 %v1563_v54 }
  0xec   : > { %937 = vmatpush.bf16.msrb.mxu0 %v1562_v37  ;;  %1581 = vmatpush.bf16.msra.mxu2 %v1562_v37 }
  0xf6   : > { %637 = vmatmul.bf16.gmra.mxu2 %v545_v63  ;;  %785 = vmatmul.bf16.gmra.mxu3 %v693_v0 }
 0x106   : > { %642 = vmatmul.bf16.gmra.mxu2 %v546_v24  ;;  %790 = vmatmul.bf16.gmra.mxu3 %v694_v25 }
 0x116   : > { %647 = vmatmul.bf16.gmra.mxu2 %v547_v39  ;;  %795 = vmatmul.bf16.gmra.mxu3 %v695_v40 }
 0x129   : > { %v613_v41 = vpop.f32.mrf.mxu2  ;;  %v761_v42 = vpop.f32.mrf.mxu3 }
 0x12a   : > { %v614_v45 = vadd.f32 %v1858_v43, %v613_v41  ;;  %v762_v46 = vadd.f32 %v1863_v44, %v761_v42 }
 0x12c   : > { %v801_v51 = vmax.f32 %v614_v45, 0.0  ;;  %v825_v52 = vmax.f32 %v762_v46, 0.0 }
 0x131   : > { %v615_v47 = vpop.f32.mrf.mxu2  ;;  %v763_v48 = vpop.f32.mrf.mxu3 }
 0x132   : > { %v616_v49 = vadd.f32 %v1858_v43, %v615_v47  ;;  %v764_v50 = vadd.f32 %v1863_v44, %v763_v48 }
 0x134   : > { %v802_v55 = vmax.f32 %v616_v49, 0.0  ;;  %v826_v56 = vmax.f32 %v764_v50, 0.0 }
 0x136   : > { %v817_v57 = vpack.c.bf16 %v802_v55, %v801_v51  ;;  %v841_v58 = vpack.c.bf16 %v826_v56, %v825_v52 }
 0x138   : > { %938 = vmatmul.bf16.vlgmr.msrb.gmra.mxu0 %v841_v58  ;;  %1035 = vmatmul.bf16.vlgmr.msrb.gmra.mxu1 %v817_v57 }
 0x139   : > { %v618_v59 = vpop.f32.mrf.mxu2  ;;  %v766_v60 = vpop.f32.mrf.mxu3 }
 0x13a   : > { %v619_v61 = vadd.f32 %v1858_v43, %v618_v59  ;;  %v767_v62 = vadd.f32 %v1863_v44, %v766_v60 }
 0x13c   : > { %v803_v3 = vmax.f32 %v619_v61, 0.0  ;;  %v827_v4 = vmax.f32 %v767_v62, 0.0 }
 0x141   : > { %v620_v63 = vpop.f32.mrf.mxu2  ;;  %v768_v0 = vpop.f32.mrf.mxu3 }
 0x142   : > { %v621_v1 = vadd.f32 %v1858_v43, %v620_v63  ;;  %v769_v2 = vadd.f32 %v1863_v44, %v768_v0 }
 0x144   : > { %v804_v5 = vmax.f32 %v621_v1, 0.0  ;;  %v828_v6 = vmax.f32 %v769_v2, 0.0 }
 0x146   : > { %v842_v7 = vpack.c.bf16 %v828_v6, %v827_v4  ;;  %v818_v8 = vpack.c.bf16 %v804_v5, %v803_v3 }
 0x148   : > { %943 = vmatmul.bf16.gmra.mxu0 %v842_v7  ;;  %1040 = vmatmul.bf16.gmra.mxu1 %v818_v8 }
 0x149   : > { %v623_v9 = vpop.f32.mrf.mxu2  ;;  %v771_v10 = vpop.f32.mrf.mxu3 }
 0x14a   : > { %v624_v11 = vadd.f32 %v1858_v43, %v623_v9  ;;  %v772_v12 = vadd.f32 %v1863_v44, %v771_v10 }
 0x14c   : > { %v805_v17 = vmax.f32 %v624_v11, 0.0  ;;  %v829_v18 = vmax.f32 %v772_v12, 0.0 }
 0x151   : > { %v625_v13 = vpop.f32.mrf.mxu2  ;;  %v773_v14 = vpop.f32.mrf.mxu3 }
 0x152   : > { %v626_v15 = vadd.f32 %v1858_v43, %v625_v13  ;;  %v774_v16 = vadd.f32 %v1863_v44, %v773_v14 }
 0x154   : > { %v806_v19 = vmax.f32 %v626_v15, 0.0  ;;  %v830_v20 = vmax.f32 %v774_v16, 0.0 }
 0x156   : > { %v843_v21 = vpack.c.bf16 %v830_v20, %v829_v18  ;;  %v819_v22 = vpack.c.bf16 %v806_v19, %v805_v17  ;;  %v1607_v19 = vmov 8  }
 0x157   : > { %1593 = vset.pattern.permute.xlu0 %v1607_v19  ;;  %1595 = vset.pattern.permute.xlu2 %v1607_v19 }
 0x158   : > { %948 = vmatmul.bf16.gmra.mxu0 %v843_v21  ;;  %1045 = vmatmul.bf16.gmra.mxu1 %v819_v22 }
 0x159   : > { %v628_v23 = vpop.f32.mrf.mxu2  ;;  %v776_v24 = vpop.f32.mrf.mxu3  ;;  %1594 = vset.pattern.permute.xlu1 %v1607_v19 }
 0x15a   : > { %v629_v25 = vadd.f32 %v1858_v43, %v628_v23  ;;  %v777_v26 = vadd.f32 %v1863_v44, %v776_v24 }
 0x15c   : > { %v807_v31 = vmax.f32 %v629_v25, 0.0  ;;  %v831_v32 = vmax.f32 %v777_v26, 0.0 }
 0x161   : > { %v630_v27 = vpop.f32.mrf.mxu2  ;;  %v778_v28 = vpop.f32.mrf.mxu3 }
 0x162   : > { %v631_v29 = vadd.f32 %v1858_v43, %v630_v27  ;;  %v779_v30 = vadd.f32 %v1863_v44, %v778_v28 }
 0x164   : > { %v808_v53 = vmax.f32 %v631_v29, 0.0  ;;  %v832_v54 = vmax.f32 %v779_v30, 0.0 }
 0x166   : > { %v844_v33 = vpack.c.bf16 %v832_v54, %v831_v32  ;;  %v820_v34 = vpack.c.bf16 %v808_v53, %v807_v31  ;;  %v1900_v32 = vld [vmem:[%s2060_s4 + $0x2] ss:$0 sm:$0xff] }
 0x168   : > { %953 = vmatmul.bf16.gmra.mxu0 %v844_v33  ;;  %1050 = vmatmul.bf16.gmra.mxu1 %v820_v34 }
 0x169   : > { %v633_v35 = vpop.f32.mrf.mxu2  ;;  %v781_v36 = vpop.f32.mrf.mxu3 }
 0x16a   : > { %v634_v37 = vadd.f32 %v1858_v43, %v633_v35  ;;  %v782_v38 = vadd.f32 %v1863_v44, %v781_v36 }
 0x16c   : > { %v809_v45 = vmax.f32 %v634_v37, 0.0  ;;  %v833_v46 = vmax.f32 %v782_v38, 0.0 }
 0x171   : > { %v635_v39 = vpop.f32.mrf.mxu2  ;;  %v783_v40 = vpop.f32.mrf.mxu3 }
 0x172   : > { %v636_v41 = vadd.f32 %v1858_v43, %v635_v39  ;;  %v784_v42 = vadd.f32 %v1863_v44, %v783_v40 }
 0x174   : > { %v810_v47 = vmax.f32 %v636_v41, 0.0  ;;  %v834_v48 = vmax.f32 %v784_v42, 0.0 }
 0x176   : > { %v845_v49 = vpack.c.bf16 %v834_v48, %v833_v46  ;;  %v821_v50 = vpack.c.bf16 %v810_v47, %v809_v45 }
 0x178   : > { %958 = vmatmul.bf16.gmra.mxu0 %v845_v49  ;;  %1055 = vmatmul.bf16.gmra.mxu1 %v821_v50 }
 0x179   : > { %v638_v51 = vpop.f32.mrf.mxu2  ;;  %v786_v52 = vpop.f32.mrf.mxu3 }
 0x17a   : > { %v639_v55 = vadd.f32 %v1858_v43, %v638_v51  ;;  %v787_v56 = vadd.f32 %v1863_v44, %v786_v52 }
 0x17c   : > { %v811_v61 = vmax.f32 %v639_v55, 0.0  ;;  %v835_v62 = vmax.f32 %v787_v56, 0.0 }
 0x181   : > { %v640_v57 = vpop.f32.mrf.mxu2  ;;  %v788_v58 = vpop.f32.mrf.mxu3 }
 0x182   : > { %v641_v59 = vadd.f32 %v1858_v43, %v640_v57  ;;  %v789_v60 = vadd.f32 %v1863_v44, %v788_v58 }
 0x184   : > { %v812_v63 = vmax.f32 %v641_v59, 0.0  ;;  %v836_v0 = vmax.f32 %v789_v60, 0.0 }
 0x186   : > { %v846_v1 = vpack.c.bf16 %v836_v0, %v835_v62  ;;  %v822_v2 = vpack.c.bf16 %v812_v63, %v811_v61 }
 0x188   : > { %963 = vmatmul.bf16.gmra.mxu0 %v846_v1  ;;  %1060 = vmatmul.bf16.gmra.mxu1 %v822_v2 }
 0x189   : > { %v643_v3 = vpop.f32.mrf.mxu2  ;;  %v791_v4 = vpop.f32.mrf.mxu3 }
 0x18a   : > { %v644_v5 = vadd.f32 %v1858_v43, %v643_v3  ;;  %v792_v6 = vadd.f32 %v1863_v44, %v791_v4 }
 0x18c   : > { %v813_v11 = vmax.f32 %v644_v5, 0.0  ;;  %v837_v12 = vmax.f32 %v792_v6, 0.0 }
 0x191   : > { %v645_v7 = vpop.f32.mrf.mxu2  ;;  %v793_v8 = vpop.f32.mrf.mxu3 }
 0x192   : > { %v646_v9 = vadd.f32 %v1858_v43, %v645_v7  ;;  %v794_v10 = vadd.f32 %v1863_v44, %v793_v8 }
 0x194   : > { %v814_v13 = vmax.f32 %v646_v9, 0.0  ;;  %v838_v14 = vmax.f32 %v794_v10, 0.0 }
 0x196   : > { %v847_v15 = vpack.c.bf16 %v838_v14, %v837_v12  ;;  %v823_v16 = vpack.c.bf16 %v814_v13, %v813_v11 }
 0x198   : > { %968 = vmatmul.bf16.gmra.mxu0 %v847_v15  ;;  %1065 = vmatmul.bf16.gmra.mxu1 %v823_v16 }
 0x199   : > { %v648_v17 = vpop.f32.mrf.mxu2  ;;  %v796_v18 = vpop.f32.mrf.mxu3 }
 0x19a   : > { %v649_v20 = vadd.f32 %v1858_v43, %v648_v17  ;;  %v797_v21 = vadd.f32 %v1863_v44, %v796_v18 }
 0x19c   : > { %v815_v26 = vmax.f32 %v649_v20, 0.0  ;;  %v839_v27 = vmax.f32 %v797_v21, 0.0 }
 0x1a1   : > { %v650_v22 = vpop.f32.mrf.mxu2  ;;  %v798_v23 = vpop.f32.mrf.mxu3 }
 0x1a2   : > { %v651_v24 = vadd.f32 %v1858_v43, %v650_v22  ;;  %v799_v25 = vadd.f32 %v1863_v44, %v798_v23 }
 0x1a4   : > { %v816_v28 = vmax.f32 %v651_v24, 0.0  ;;  %v840_v29 = vmax.f32 %v799_v25, 0.0 }
 0x1a6   : > { %v848_v30 = vpack.c.bf16 %v840_v29, %v839_v27  ;;  %v824_v31 = vpack.c.bf16 %v816_v28, %v815_v26 }
 0x1a8   : > { %973 = vmatmul.bf16.vlgmr.msra.gmra.mxu2 %v848_v30  ;;  %1070 = vmatmul.bf16.gmra.mxu1 %v824_v31 }
 0x1b5   : > { %v939_v53 = vpop.f32.mrf.mxu0  ;;  %v1036_v54 = vpop.f32.mrf.mxu1 }
 0x1b6   : > { %v1037_v33 = vadd.f32 %v1036_v54, %v939_v53 }
 0x1b8   : > { %v1903_v43 = vadd.f32 %v1900_v32, %v1037_v33 }
 0x1ba   : > { %1096 = vperm.xlu0 %1593, %v1903_v43   ;;  %v1207_v20 = vsel %vm1190_vm1, %v1903_v43, 0.0 }
 0x1bd   : > { %v941_v44 = vpop.f32.mrf.mxu0  ;;  %v1038_v34 = vpop.f32.mrf.mxu1 }
 0x1be   : > { %v1039_v35 = vadd.f32 %v1038_v34, %v941_v44 }
 0x1c0   : > { %v1907_v36 = vadd.f32 %v1900_v32, %v1039_v35 }
 0x1c2   : > { %1101 = vperm.xlu0 %1593, %v1907_v36   ;;  %v1208_v19 = vsel %vm1190_vm1, %v1907_v36, 0.0 }
 0x1c3   : > { %v1209_v22 = vadd.f32 %v1208_v19, %v1207_v20 }
 0x1c5   : > { %v944_v37 = vpop.f32.mrf.mxu0  ;;  %v1041_v38 = vpop.f32.mrf.mxu1 }
 0x1c6   : > { %v1042_v39 = vadd.f32 %v1041_v38, %v944_v37 }
 0x1c8   : > { %v1943_v17 = vadd.f32 %v1900_v32, %v1042_v39 }
 0x1ca   : > { %v1210_v21 = vsel %vm1190_vm1, %v1943_v17, 0.0 }
 0x1cb   : > { %v1211_v27 = vadd.f32 %v1210_v21, %v1209_v22 }
 0x1cd   : > { %v946_v40 = vpop.f32.mrf.mxu0  ;;  %v1043_v41 = vpop.f32.mrf.mxu1 }
 0x1ce   : > { %v1044_v42 = vadd.f32 %v1043_v41, %v946_v40 }
 0x1d0   : > { %v1911_v45 = vadd.f32 %v1900_v32, %v1044_v42 }
 0x1d2   : > { %1111 = vperm.xlu2 %1595, %v1911_v45   ;;  %v1212_v25 = vsel %vm1190_vm1, %v1911_v45, 0.0 }
 0x1d3   : > { %v1213_v30 = vadd.f32 %v1212_v25, %v1211_v27 }
 0x1d5   : > { %v949_v46 = vpop.f32.mrf.mxu0  ;;  %v1046_v47 = vpop.f32.mrf.mxu1 }
 0x1d6   : > { %v1047_v48 = vadd.f32 %v1046_v47, %v949_v46 }
 0x1d8   : > { %v1915_v49 = vadd.f32 %v1900_v32, %v1047_v48 }
 0x1da   : > { %1116 = vperm.xlu2 %1595, %v1915_v49   ;;  %v1214_v28 = vsel %vm1190_vm1, %v1915_v49, 0.0 }
 0x1db   : > { %v1215_v53 = vadd.f32 %v1214_v28, %v1213_v30 }
 0x1dd   : > { %v951_v50 = vpop.f32.mrf.mxu0  ;;  %v1048_v51 = vpop.f32.mrf.mxu1 }
 0x1de   : > { %v1049_v52 = vadd.f32 %v1048_v51, %v951_v50 }
 0x1e0   : > { %v1919_v55 = vadd.f32 %v1900_v32, %v1049_v52 }
 0x1e2   : > { %1121 = vperm.xlu0 %1593, %v1919_v55   ;;  %v1216_v31 = vsel %vm1190_vm1, %v1919_v55, 0.0 }
 0x1e3   : > { %v1217_v33 = vadd.f32 %v1216_v31, %v1215_v53 }
 0x1e5   : > { %v954_v56 = vpop.f32.mrf.mxu0  ;;  %v1051_v57 = vpop.f32.mrf.mxu1 }
 0x1e6   : > { %v1052_v58 = vadd.f32 %v1051_v57, %v954_v56 }
 0x1e8   : > { %v1923_v59 = vadd.f32 %v1900_v32, %v1052_v58 }
 0x1ea   : > { %1126 = vperm.xlu2 %1595, %v1923_v59   ;;  %v1218_v54 = vsel %vm1190_vm1, %v1923_v59, 0.0 }
 0x1eb   : > { %v1219_v35 = vadd.f32 %v1218_v54, %v1217_v33 }
 0x1ed   : > { %v956_v60 = vpop.f32.mrf.mxu0  ;;  %v1053_v61 = vpop.f32.mrf.mxu1 }
 0x1ee   : > { %v1054_v62 = vadd.f32 %v1053_v61, %v956_v60 }
 0x1f0   : > { %v1927_v63 = vadd.f32 %v1900_v32, %v1054_v62 }
 0x1f2   : > { %1131 = vperm.xlu0 %1593, %v1927_v63   ;;  %v1220_v44 = vsel %vm1190_vm1, %v1927_v63, 0.0 }
 0x1f3   : > { %v1221_v38 = vadd.f32 %v1220_v44, %v1219_v35 }
 0x1f5   : > { %v959_v0 = vpop.f32.mrf.mxu0  ;;  %v1056_v1 = vpop.f32.mrf.mxu1 }
 0x1f6   : > { %v1057_v2 = vadd.f32 %v1056_v1, %v959_v0 }
 0x1f8   : > { %v1931_v3 = vadd.f32 %v1900_v32, %v1057_v2 }
 0x1fa   : > { %1136 = vperm.xlu2 %1595, %v1931_v3   ;;  %v1222_v37 = vsel %vm1190_vm1, %v1931_v3, 0.0 }
 0x1fb   : > { %v1223_v42 = vadd.f32 %v1222_v37, %v1221_v38 }
 0x1fd   : > { %v961_v4 = vpop.f32.mrf.mxu0  ;;  %v1058_v5 = vpop.f32.mrf.mxu1 }
 0x1fe   : > { %v1059_v6 = vadd.f32 %v1058_v5, %v961_v4 }
 0x200   : > { %v1935_v7 = vadd.f32 %v1900_v32, %v1059_v6 }
 0x202   : > { %1141 = vperm.xlu0 %1593, %v1935_v7   ;;  %v1224_v40 = vsel %vm1190_vm1, %v1935_v7, 0.0 }
 0x203   : > { %v1225_v52 = vadd.f32 %v1224_v40, %v1223_v42 }
 0x205   : > { %v964_v8 = vpop.f32.mrf.mxu0  ;;  %v1061_v9 = vpop.f32.mrf.mxu1 }
 0x206   : > { %v1062_v10 = vadd.f32 %v1061_v9, %v964_v8 }
 0x208   : > { %v1939_v11 = vadd.f32 %v1900_v32, %v1062_v10 }
 0x20a   : > { %1146 = vperm.xlu2 %1595, %v1939_v11   ;;  %v1226_v47 = vsel %vm1190_vm1, %v1939_v11, 0.0 }
 0x20b   : > { %v1227_v60 = vadd.f32 %v1226_v47, %v1225_v52 }
 0x20d   : > { %v966_v12 = vpop.f32.mrf.mxu0  ;;  %v1063_v13 = vpop.f32.mrf.mxu1 }
 0x20e   : > { %v1064_v34 = vadd.f32 %v1063_v13, %v966_v12 }
 0x210   : > { %v1974_v41 = vadd.f32 %v1900_v32, %v1064_v34 }
 0x212   : > { %v1228_v58 = vsel %vm1190_vm1, %v1974_v41, 0.0 }
 0x213   : > { %v1229_v0 = vadd.f32 %v1228_v58, %v1227_v60 }
 0x215   : > { %v969_v14 = vpop.f32.mrf.mxu0  ;;  %v1066_v15 = vpop.f32.mrf.mxu1 }
 0x216   : > { %v1067_v16 = vadd.f32 %v1066_v15, %v969_v14 }
 0x218   : > { %v1946_v18 = vadd.f32 %v1900_v32, %v1067_v16 }
 0x21a   : > { %1156 = vperm.xlu0 %1593, %v1946_v18   ;;  %v1230_v62 = vsel %vm1190_vm1, %v1946_v18, 0.0 }
 0x21b   : > { %v1231_v2 = vadd.f32 %v1230_v62, %v1229_v0 }
 0x21d   : > { %v971_v23 = vpop.f32.mrf.mxu0  ;;  %v1068_v24 = vpop.f32.mrf.mxu1 }
 0x21e   : > { %v1069_v26 = vadd.f32 %v1068_v24, %v971_v23 }
 0x220   : > { %v1960_v29 = vadd.f32 %v1900_v32, %v1069_v26 }
 0x222   : > { %1161 = vperm.xlu2 %1595, %v1960_v29  }
 0x225   : > { %v1071_v39 = vpop.f32.mrf.mxu1 }
 0x22b   : > { %v974_v46 = vpop.f32.mrf.mxu2 }
 0x22c   : > { %v1072_v48 = vadd.f32 %v1071_v39, %v974_v46  ;;  %v1112_v50 = vpop.permute.xlu2 %1111  ;;  %v1097_v51 = vpop.permute.xlu0 %1096 }
 0x22d   : > { %v1177_v56 = vadd.f32 %v1112_v50, %v1911_v45  ;;  %v1174_v57 = vadd.f32 %v1097_v51, %v1903_v43  ;;  %v1232_v43 = vsel %vm1190_vm1, %v1960_v29, 0.0  ;;  %v1073_v45 = vpop.f32.mrf.mxu1 }
 0x22e   : > { %v1992_v61 = vadd.f32 %v1900_v32, %v1072_v48  ;;  %v1233_v12 = vadd.f32 %v1232_v43, %v1231_v2 }
 0x22f   : > { %1194 = vst.msk [vmem:[%s1983_s12 + $0x18] sm:$0xff] %vm1190_vm1, %v1177_v56 }
 0x230   : > { %1191 = vst.msk [vmem:[%s1983_s12] sm:$0xff] %vm1190_vm1, %v1174_v57  ;;  %v1234_v8 = vsel %vm1190_vm1, %v1992_v61, 0.0 }
 0x231   : > { %v1235_v14 = vadd.f32 %v1234_v8, %v1233_v12 }
 0x233   : > { %v976_v1 = vpop.f32.mrf.mxu2 }
 0x234   : > { %v1074_v4 = vadd.f32 %v1073_v45, %v976_v1  ;;  %v1117_v5 = vpop.permute.xlu2 %1116  ;;  %v1102_v6 = vpop.permute.xlu0 %1101 }
 0x235   : > { %v1178_v9 = vadd.f32 %v1117_v5, %v1915_v49  ;;  %v1175_v10 = vadd.f32 %v1102_v6, %v1907_v36 }
 0x236   : > { %v1093_v13 = vadd.f32 %v1900_v32, %v1074_v4 }
 0x237   : > { %1195 = vst.msk [vmem:[%s1983_s12 + $0x20] sm:$0xff] %vm1190_vm1, %v1178_v9 }
 0x238   : > { %1192 = vst.msk [vmem:[%s1983_s12 + $0x8] sm:$0xff] %vm1190_vm1, %v1175_v10  ;;  %1171 = vperm.xlu0 %1593, %v1093_v13   ;;  %v1236_v15 = vsel %vm1190_vm1, %v1093_v13, 0.0 }
 0x239   : > { %v1237_v16 = vadd.f32 %v1236_v15, %v1235_v14 }
 0x23b   : > { %1238 = vadd.xlane.f32.xlu1 %v1237_v16 }
 0x244   : > { %v1127_v19 = vpop.permute.xlu2 %1126 }
 0x245   : > { %v1180_v49 = vadd.f32 %v1127_v19, %v1923_v59 }
 0x247   : > { %1197 = vst.msk [vmem:[%s1983_s12 + $0x30] sm:$0xff] %vm1190_vm1, %v1180_v49 }
 0x254   : > { %v1137_v32 = vpop.permute.xlu2 %1136  ;;  %v1122_v36 = vpop.permute.xlu0 %1121  ;;  %1106 = vperm.xlu1 %1594, %v1943_v17  }
 0x255   : > { %v1182_v20 = vadd.f32 %v1137_v32, %v1931_v3  ;;  %v1179_v21 = vadd.f32 %v1122_v36, %v1919_v55 }
 0x257   : > { %1199 = vst.msk [vmem:[%s1983_s12 + $0x40] sm:$0xff] %vm1190_vm1, %v1182_v20 }
 0x258   : > { %1196 = vst.msk [vmem:[%s1983_s12 + $0x28] sm:$0xff] %vm1190_vm1, %v1179_v21 }
 0x25c   : > { %1151 = vperm.xlu1 %1594, %v1974_v41  }
 0x264   : > { %v1147_v59 = vpop.permute.xlu2 %1146  ;;  %v1132_v22 = vpop.permute.xlu0 %1131  ;;  %1166 = vperm.xlu1 %1594, %v1992_v61  }
 0x265   : > { %v1184_v23 = vadd.f32 %v1147_v59, %v1939_v11  ;;  %v1181_v24 = vadd.f32 %v1132_v22, %v1927_v63 }
 0x267   : > { %1201 = vst.msk [vmem:[%s1983_s12 + $0x50] sm:$0xff] %vm1190_vm1, %v1184_v23 }
 0x268   : > { %1198 = vst.msk [vmem:[%s1983_s12 + $0x38] sm:$0xff] %vm1190_vm1, %v1181_v24 }
 0x274   : > { %v1142_v55 = vpop.permute.xlu0 %1141 }
 0x275   : > { %v1183_v3 = vadd.f32 %v1142_v55, %v1935_v7 }
 0x277   : > { %1200 = vst.msk [vmem:[%s1983_s12 + $0x48] sm:$0xff] %vm1190_vm1, %v1183_v3 }
 0x27c   : > { %v1162_v25 = vpop.permute.xlu2 %1161 }
 0x27d   : > { %v1187_v26 = vadd.f32 %v1162_v25, %v1960_v29 }
 0x27f   : > { %1204 = vst.msk [vmem:[%s1983_s12 + $0x68] sm:$0xff] %vm1190_vm1, %v1187_v26 }
 0x28c   : > { %v1157_v27 = vpop.permute.xlu0 %1156 }
 0x28d   : > { %v1186_v11 = vadd.f32 %v1157_v27, %v1946_v18 }
 0x28f   : > { %1203 = vst.msk [vmem:[%s1983_s12 + $0x60] sm:$0xff] %vm1190_vm1, %v1186_v11 }
 0x2aa   : > { %v1172_v63 = vpop.permute.xlu0 %1171 }
 0x2ab   : > { %v1189_v28 = vadd.f32 %v1172_v63, %v1093_v13 }
 0x2ad   : > { %1206 = vst.msk [vmem:[%s1983_s12 + $0x78] sm:$0xff] %vm1190_vm1, %v1189_v28 }
 0x2ae   : > { %v1239_v30 = vpop.xlane.xlu1 %1238 }
 0x2af   : > { %v1240_v7 = vrot.slane %v1239_v30, 4 }
 0x2b1   : > { %v1241_v31 = vadd.f32 %v1240_v7, %v1239_v30 }
 0x2b3   : > { %v1242_v29 = vrot.slane %v1241_v31, 2 }
 0x2b5   : > { %v1243_v53 = vadd.f32 %v1242_v29, %v1241_v31 }
 0x2b7   : > { %v1244_v54 = vrot.slane %v1243_v53, 1 }
 0x2b9   : > { %v1245_v33 = vadd.f32 %v1244_v54, %v1243_v53 }
 0x2bb   : > { %1582 = vpush %v1245_v33 }
 0x2c6   : > { %v1107_v44 = vpop.permute.xlu1 %1106 }
 0x2c7   : > { %v1176_v18 = vadd.f32 %v1107_v44, %v1943_v17 }
 0x2c9   : > { %1193 = vst.msk [vmem:[%s1983_s12 + $0x10] sm:$0xff] %vm1190_vm1, %v1176_v18 }
 0x2ce   : > { %v1152_v34 = vpop.permute.xlu1 %1151 }
 0x2cf   : > { %v1185_v35 = vadd.f32 %v1152_v34, %v1974_v41 }
 0x2d1   : > { %1202 = vst.msk [vmem:[%s1983_s12 + $0x58] sm:$0xff] %vm1190_vm1, %v1185_v35 }
 0x2d6   : > { %v1167_v37 = vpop.permute.xlu1 %1166 }
 0x2d7   : > { %v1188_v38 = vadd.f32 %v1167_v37, %v1992_v61 }
 0x2d9   : > { %1205 = vst.msk [vmem:[%s1983_s12 + $0x70] sm:$0xff] %vm1190_vm1, %v1188_v38 }
 0x2ec   : > { %s1583_s14 = spop %1582 }
 0x2ed   : > { %v1247_v17 = vstv %s1583_s14 }
 0x2ee   : > { %1249 = vst.msk [vmem:[%s263_s13] sm:$0x1] %vm1248_vm2, %v1247_v17 }
 0x2ef PF: > { %s17_s21 = sadd.s32 1, %s1605_s21  }
 0x2f0   : > { %p14_p5 = scmp.ge.s32.totalorder %s17_s21, 4  }
 0x2f2   :  { %16 = sbr.rel (!%p14_p5) target bundleno = 1 (0x1), region = 84 }

</bundles_post_ra>
